<compile_context>
chip_gen: v7x
topology: tpu7x:2x2x1
jax: 0.10.0
libtpu: 0.0.40
codegen_flags: <defaults>
</compile_context>

<pallas_src>
import jax
import jax.numpy as jnp
from jax.experimental import pallas as pl
from jax.experimental.pallas import tpu as pltpu


def double_conv_kernel(x_ref, w1_ref, b1_ref, w2_ref, b2_ref, o_ref,
                       xv_ref, midv_ref):
    # x_ref:    (NB, H, W*Cin)         bf16  lane-fused input slab, NB images per step
    # w1_ref:   (3*W*Cin,  W*Cmid)     bf16  dy-stacked block-banded conv1 weights
    # b1_ref:   (1, W*Cmid)            f32
    # w2_ref:   (3*W*Cmid, W*Cout)     bf16  dy-stacked block-banded conv2 weights
    # b2_ref:   (1, W*Cout)            f32
    # o_ref:    (NB, H, W*Cout)        bf16  lane-fused output slab
    # xv_ref:   VMEM (NB*(H+2), W*Cin) bf16  stacked, vertically padded input
    # midv_ref: VMEM (NB*(H+2), W*Cmid)bf16  stacked, vertically padded intermediate
    NB, H, _ = x_ref.shape
    Hp = H + 2
    M = NB * Hp - 2                      # matmul M; rows m = b*Hp + h (h < H) are valid

    # One-time zero init: halo rows stay zero across all grid steps, interior rows are
    # fully rewritten every step.  Sound because the grid axis is "arbitrary"
    # (sequential on one core), so step 0 always runs first on this scratch.
    @pl.when(pl.program_id(0) == 0)
    def _init():
        xv_ref[...] = jnp.zeros_like(xv_ref)
        midv_ref[...] = jnp.zeros_like(midv_ref)

    # Scatter the NB images into the stacked padded slab (interior rows only; the
    # per-image zero halo rows are untouched and remain zero).
    for b in range(NB):
        xv_ref[b * Hp + 1:b * Hp + 1 + H, :] = x_ref[b]

    # ---- conv1: single K-fused banded matmul.  Operand row m is the three dy taps
    # ---- [xv[m], xv[m+1], xv[m+2]] laid side by side along lanes (K = 3*W*Cin).
    xcat = jnp.concatenate(
        [xv_ref[0:M, :], xv_ref[1:1 + M, :], xv_ref[2:2 + M, :]], axis=1)
    acc1 = jax.lax.dot_general(
        xcat, w1_ref[...],
        dimension_numbers=(((1,), (0,)), ((), ())),
        preferred_element_type=jnp.float32)
    y1 = jnp.maximum(acc1 + b1_ref[...], 0.0)                 # bias + ReLU in f32

    # Zero the junk rows (rows whose index hits an image halo position) so the single
    # contiguous store below keeps midv's per-image halo rows at zero.
    row = jax.lax.broadcasted_iota(jnp.int32, (M, 1), 0)
    y1 = jnp.where((row % Hp) < H, y1, 0.0)
    midv_ref[1:1 + M, :] = y1.astype(midv_ref.dtype)

    # ---- conv2: same K-fused banded matmul on the padded intermediate (K = 3*W*Cmid).
    mcat = jnp.concatenate(
        [midv_ref[0:M, :], midv_ref[1:1 + M, :], midv_ref[2:2 + M, :]], axis=1)
    acc2 = jax.lax.dot_general(
        mcat, w2_ref[...],
        dimension_numbers=(((1,), (0,)), ((), ())),
        preferred_element_type=jnp.float32)
    y2 = jnp.maximum(acc2 + b2_ref[...], 0.0).astype(o_ref.dtype)

    # Store only the valid rows of each image (junk/halo rows are skipped).
    for b in range(NB):
        o_ref[b] = y2[b * Hp:b * Hp + H, :]


def _banded_conv_weights(w_hwio, width):
    """HWIO (3, 3, Ci, Co) conv weights -> (3*width*Ci, width*Co) dy-stacked banded mat.

    Per-dy band: B_dy[w'*Ci + ci, w*Co + co] = w_hwio[dy, w' - w + 1, ci, co] inside the
    band, zero outside, so a SAME-padded 3x3 conv row in the lane-fused (w*c) layout is
      out[h, :] = sum_dy xpad_rows[h + dy, :] @ B_dy
    with the horizontal zero padding absorbed by the clipped band edges.  The three
    bands are stacked along K (dy-major) to match the lane-concatenated operand.
    """
    kh, kw, Ci, Co = w_hwio.shape
    mats = []
    for dy in range(kh):
        B = jnp.zeros((width * Ci, width * Co), w_hwio.dtype)
        for dx in range(kw):
            # S[w', w] = 1  iff  w' = w + dx - 1
            shift = jnp.eye(width, width, k=1 - dx, dtype=w_hwio.dtype)
            B = B + jnp.kron(shift, w_hwio[dy, dx])
        mats.append(B)
    return jnp.concatenate(mats, axis=0)


def prepare_double_conv_params(w1_hwio, b1, w2_hwio, b2, width):
    """One-time parameter prep (hoisted out of the per-forward path)."""
    Cmid = w1_hwio.shape[-1]
    Cout = w2_hwio.shape[-1]
    w1cat = _banded_conv_weights(w1_hwio, width).astype(jnp.bfloat16)   # (3*W*Cin,  W*Cmid)
    w2cat = _banded_conv_weights(w2_hwio, width).astype(jnp.bfloat16)   # (3*W*Cmid, W*Cout)
    b1_row = jnp.tile(b1.reshape(1, Cmid), (1, width)).astype(jnp.float32)  # (1, W*Cmid)
    b2_row = jnp.tile(b2.reshape(1, Cout), (1, width)).astype(jnp.float32)  # (1, W*Cout)
    return w1cat, b1_row, w2cat, b2_row


def _pick_images_per_step(n, h, target_rows=256):
    """Largest divisor NB of n with NB*(h+2) <= target_rows (fills the MXU M dim)."""
    nb = 1
    for d in range(1, n + 1):
        if n % d == 0 and d * (h + 2) <= target_rows:
            nb = d
    return nb


def double_conv_slabs(x_slab, w1cat, b1_row, w2cat, b2_row):
    """Kernel-native entry point: (N, H, W*Cin) bf16 slabs -> (N, H, W*Cout) bf16 slabs."""
    N, H, WCin = x_slab.shape
    WCmid = b1_row.shape[1]
    WCout = b2_row.shape[1]
    NB = _pick_images_per_step(N, H)
    Hp = H + 2

    return pl.pallas_call(
        double_conv_kernel,
        out_shape=jax.ShapeDtypeStruct((N, H, WCout), jnp.bfloat16),
        grid=(N // NB,),
        in_specs=[
            pl.BlockSpec((NB, H, WCin), lambda g: (g, 0, 0)),
            pl.BlockSpec((3 * WCin, WCmid), lambda g: (0, 0)),
            pl.BlockSpec((1, WCmid), lambda g: (0, 0)),
            pl.BlockSpec((3 * WCmid, WCout), lambda g: (0, 0)),
            pl.BlockSpec((1, WCout), lambda g: (0, 0)),
        ],
        out_specs=pl.BlockSpec((NB, H, WCout), lambda g: (g, 0, 0)),
        scratch_shapes=[
            pltpu.VMEM((NB * Hp, WCin), jnp.bfloat16),    # stacked padded input
            pltpu.VMEM((NB * Hp, WCmid), jnp.bfloat16),   # stacked padded intermediate
        ],
        compiler_params=pltpu.CompilerParams(
            # "arbitrary": sequential grid on one core => one-time scratch init is
            # sound; plain "parallel" has no measured codegen benefit on current Mosaic.
            dimension_semantics=("arbitrary",),
            vmem_limit_bytes=32 * 1024 * 1024,            # safe on v5e/v6e/v7x
        ),
    )(x_slab, w1cat, b1_row, w2cat, b2_row)


def double_conv_nchw(x_nchw, w1cat, b1_row, w2cat, b2_row):
    """Module-semantics wrapper: NCHW f32 in, NCHW f32 out (layout plumbing only; a
    fused pipeline would consume the bf16 (N, H, W*C) slabs from double_conv_slabs)."""
    N, Cin, H, W = x_nchw.shape
    Cout = b2_row.shape[1] // W
    x_slab = jnp.transpose(x_nchw, (0, 2, 3, 1)).reshape(N, H, W * Cin)
    x_slab = x_slab.astype(jnp.bfloat16)
    out_slab = double_conv_slabs(x_slab, w1cat, b1_row, w2cat, b2_row)
    out = out_slab.astype(jnp.float32).reshape(N, H, W, Cout)
    return jnp.transpose(out, (0, 3, 1, 2))


def spectral_normalize(w_oihw, key, n_power_iterations=1, eps=1e-12):
    """PyTorch-style spectral norm of a Conv2d weight (Cout, Cin, kh, kw): W / sigma,
    sigma estimated by power iteration on W reshaped to (Cout, -1).  Parameter-side
    preprocessing kept in plain JAX (one-shot; no persistent u buffer as in torch)."""
    out_c = w_oihw.shape[0]
    w_mat = w_oihw.reshape(out_c, -1)
    u = jax.random.normal(key, (out_c,), dtype=w_oihw.dtype)
    u = u / (jnp.linalg.norm(u) + eps)
    v = None
    for _ in range(n_power_iterations):
        v = w_mat.T @ u
        v = v / (jnp.linalg.norm(v) + eps)
        u = w_mat @ v
        u = u / (jnp.linalg.norm(u) + eps)
    sigma = u @ (w_mat @ v)
    return w_oihw / sigma


def ref_double_conv(x_nchw, w1_hwio, b1, w2_hwio, b2):
    """Pure-JAX f32 reference (lax.conv) for correctness checking."""
    y = jnp.transpose(x_nchw, (0, 2, 3, 1))
    y = jax.lax.conv_general_dilated(
        y, w1_hwio, (1, 1), 'SAME', dimension_numbers=('NHWC', 'HWIO', 'NHWC'))
    y = jnp.maximum(y + b1.reshape(1, 1, 1, -1), 0.0)
    y = jax.lax.conv_general_dilated(
        y, w2_hwio, (1, 1), 'SAME', dimension_numbers=('NHWC', 'HWIO', 'NHWC'))
    y = jnp.maximum(y + b2.reshape(1, 1, 1, -1), 0.0)
    return jnp.transpose(y, (0, 3, 1, 2))


if __name__ == "__main__":
    # Small shapes consistent with the module: DoubleConv(in=4, out=8) -> mid=8
    N, Cin, H, W = 2, 4, 16, 16
    Cmid, Cout = 8, 8

    key = jax.random.PRNGKey(0)
    kx, kw1, kb1, kw2, kb2, ku1, ku2 = jax.random.split(key, 7)

    x = jax.random.normal(kx, (N, Cin, H, W), dtype=jnp.float32)

    # Deterministic parameter init (PyTorch OIHW layout), then spectral norm.
    w1_oihw = jax.random.normal(kw1, (Cmid, Cin, 3, 3), jnp.float32) * 0.2
    b1 = jax.random.normal(kb1, (Cmid,), jnp.float32) * 0.1
    w2_oihw = jax.random.normal(kw2, (Cout, Cmid, 3, 3), jnp.float32) * 0.2
    b2 = jax.random.normal(kb2, (Cout,), jnp.float32) * 0.1

    w1_oihw = spectral_normalize(w1_oihw, ku1)
    w2_oihw = spectral_normalize(w2_oihw, ku2)

    # OIHW -> HWIO for the NHWC-style kernel math.
    w1_hwio = jnp.transpose(w1_oihw, (2, 3, 1, 0))
    w2_hwio = jnp.transpose(w2_oihw, (2, 3, 1, 0))

    # One-time parameter prep (banded weights + tiled biases), hoisted out of forward.
    params = prepare_double_conv_params(w1_hwio, b1, w2_hwio, b2, W)
    params = jax.block_until_ready(params)

    out = jax.jit(double_conv_nchw)(x, *params)
    out = jax.block_until_ready(out)

    ref = ref_double_conv(x, w1_hwio, b1, w2_hwio, b2)
    assert out.shape == (N, Cout, H, W)
    # bf16 MXU operands + bf16 output => usual bf16 epsilon tolerance.
    max_err = float(jnp.max(jnp.abs(out - ref)))
    assert jnp.allclose(out, ref, rtol=5e-2, atol=5e-2), max_err

    print("KERNEL_OK")
</pallas_src>

<mosaic_0001>
module attributes {stable_mosaic.version = 11 : i64} {
  func.func @double_conv_kernel(%arg0: i32, %arg1: memref<2x16x64xbf16, #tpu.memory_space<vmem>>, %arg2: memref<192x128xbf16, #tpu.memory_space<vmem>>, %arg3: memref<1x128xf32, #tpu.memory_space<vmem>>, %arg4: memref<384x128xbf16, #tpu.memory_space<vmem>>, %arg5: memref<1x128xf32, #tpu.memory_space<vmem>>, %arg6: memref<2x16x128xbf16, #tpu.memory_space<vmem>>, %arg7: memref<36x64xbf16, #tpu.memory_space<vmem>>, %arg8: memref<36x128xbf16, #tpu.memory_space<vmem>>) attributes {dimension_semantics = [#tpu.dimension_semantics<arbitrary>], iteration_bounds = array<i64: 1>, scalar_prefetch = 0 : i64, scratch_operands = 2 : i64, tpu.core_type = #tpu.core_type<tc>, window_params = [{transform_indices = @transform_0, window_bounds = array<i64: 2, 16, 64>}, {pipeline_mode = #tpu.pipeline_mode<synchronous>, transform_indices = @transform_1, window_bounds = array<i64: 192, 128>}, {pipeline_mode = #tpu.pipeline_mode<synchronous>, transform_indices = @transform_2, window_bounds = array<i64: 1, 128>}, {pipeline_mode = #tpu.pipeline_mode<synchronous>, transform_indices = @transform_3, window_bounds = array<i64: 384, 128>}, {pipeline_mode = #tpu.pipeline_mode<synchronous>, transform_indices = @transform_4, window_bounds = array<i64: 1, 128>}, {transform_indices = @transform_5, window_bounds = array<i64: 2, 16, 128>}]} {
    %c0_i32 = arith.constant 0 : i32
    %0 = arith.cmpi eq, %arg0, %c0_i32 : i32
    %1 = arith.extui %0 : i1 to i32
    %c0_i32_0 = arith.constant 0 : i32
    %2 = arith.cmpi ne, %1, %c0_i32_0 : i32
    scf.if %2 {
      %cst_43 = arith.constant 0.000000e+00 : bf16
      %65 = vector.broadcast %cst_43 : bf16 to vector<36x64xbf16>
      %c0_44 = arith.constant 0 : index
      %c0_45 = arith.constant 0 : index
      %66 = vector.load %arg7[%c0_44, %c0_45] : memref<36x64xbf16, #tpu.memory_space<vmem>>, vector<36x64xbf16>
      tpu.vector_store %arg7[%c0_44, %c0_45], %65 {strides = array<i32>} : memref<36x64xbf16, #tpu.memory_space<vmem>>, vector<36x64xbf16>,
      %cst_46 = arith.constant 0.000000e+00 : bf16
      %67 = vector.broadcast %cst_46 : bf16 to vector<36x128xbf16>
      %c0_47 = arith.constant 0 : index
      %c0_48 = arith.constant 0 : index
      %68 = vector.load %arg8[%c0_47, %c0_48] : memref<36x128xbf16, #tpu.memory_space<vmem>>, vector<36x128xbf16>
      tpu.vector_store %arg8[%c0_47, %c0_48], %67 {strides = array<i32>} : memref<36x128xbf16, #tpu.memory_space<vmem>>, vector<36x128xbf16>,
    } else {
    }
    %c0 = arith.constant 0 : index
    %c0_1 = arith.constant 0 : index
    %c0_2 = arith.constant 0 : index
    %3 = vector.load %arg1[%c0, %c0_1, %c0_2] : memref<2x16x64xbf16, #tpu.memory_space<vmem>>, vector<1x16x64xbf16>
    %4 = vector.shape_cast %3 : vector<1x16x64xbf16> to vector<16x64xbf16>
    %c1 = arith.constant 1 : index
    %c0_3 = arith.constant 0 : index
    %5 = vector.load %arg7[%c1, %c0_3] : memref<36x64xbf16, #tpu.memory_space<vmem>>, vector<16x64xbf16>
    tpu.vector_store %arg7[%c1, %c0_3], %4 {strides = array<i32>} : memref<36x64xbf16, #tpu.memory_space<vmem>>, vector<16x64xbf16>,
    %c1_4 = arith.constant 1 : index
    %c0_5 = arith.constant 0 : index
    %c0_6 = arith.constant 0 : index
    %6 = vector.load %arg1[%c1_4, %c0_5, %c0_6] : memref<2x16x64xbf16, #tpu.memory_space<vmem>>, vector<1x16x64xbf16>
    %7 = vector.shape_cast %6 : vector<1x16x64xbf16> to vector<16x64xbf16>
    %c19 = arith.constant 19 : index
    %c0_7 = arith.constant 0 : index
    %8 = vector.load %arg7[%c19, %c0_7] : memref<36x64xbf16, #tpu.memory_space<vmem>>, vector<16x64xbf16>
    tpu.vector_store %arg7[%c19, %c0_7], %7 {strides = array<i32>} : memref<36x64xbf16, #tpu.memory_space<vmem>>, vector<16x64xbf16>,
    %c0_8 = arith.constant 0 : index
    %c0_9 = arith.constant 0 : index
    %9 = vector.load %arg7[%c0_8, %c0_9] : memref<36x64xbf16, #tpu.memory_space<vmem>>, vector<34x64xbf16>
    %c1_10 = arith.constant 1 : index
    %c0_11 = arith.constant 0 : index
    %10 = vector.load %arg7[%c1_10, %c0_11] : memref<36x64xbf16, #tpu.memory_space<vmem>>, vector<34x64xbf16>
    %c2 = arith.constant 2 : index
    %c0_12 = arith.constant 0 : index
    %11 = vector.load %arg7[%c2, %c0_12] : memref<36x64xbf16, #tpu.memory_space<vmem>>, vector<34x64xbf16>
    %12 = tpu.concatenate %9, %10, %11 in 1 : vector<34x64xbf16>, vector<34x64xbf16>, vector<34x64xbf16> -> vector<34x192xbf16>
    %c0_13 = arith.constant 0 : index
    %c0_14 = arith.constant 0 : index
    %13 = vector.load %arg2[%c0_13, %c0_14] : memref<192x128xbf16, #tpu.memory_space<vmem>>, vector<192x128xbf16>
    %cst = arith.constant dense<0.000000e+00> : vector<34x128xf32>
    %14 = tpu.matmul %12, %13, %cst {dimension_numbers = #tpu.dot_dimension_numbers<[1], [0], [0], [1], [0, 0, 1, 1], [], []>} : vector<34x192xbf16>, vector<192x128xbf16>, vector<34x128xf32> -> vector<34x128xf32>
    %c0_15 = arith.constant 0 : index
    %c0_16 = arith.constant 0 : index
    %15 = vector.load %arg3[%c0_15, %c0_16] : memref<1x128xf32, #tpu.memory_space<vmem>>, vector<1x128xf32>
    %16 = vector.broadcast %15 : vector<1x128xf32> to vector<34x128xf32>
    %17 = arith.addf %14, %16 : vector<34x128xf32>
    %cst_17 = arith.constant 0.000000e+00 : f32
    %18 = vector.broadcast %cst_17 : f32 to vector<34x128xf32>
    %19 = arith.maximumf %17, %18 : vector<34x128xf32>
    %20 = tpu.iota {dimensions = array<i32: 0>} : vector<34x1xi32>
    %c18_i32 = arith.constant 18 : i32
    %c0_i32_18 = arith.constant 0 : i32
    %21 = arith.cmpi eq, %c18_i32, %c0_i32_18 : i32
    %c1_i32 = arith.constant 1 : i32
    %22 = arith.select %21, %c1_i32, %c18_i32 : i32
    %23 = vector.broadcast %22 : i32 to vector<34x1xi32>
    %24 = arith.remsi %20, %23 : vector<34x1xi32>
    %c0_i32_19 = arith.constant 0 : i32
    %25 = vector.broadcast %c0_i32_19 : i32 to vector<34x1xi32>
    %26 = arith.cmpi ne, %24, %25 : vector<34x1xi32>
    %c0_i32_20 = arith.constant 0 : i32
    %27 = vector.broadcast %c0_i32_20 : i32 to vector<34x1xi32>
    %28 = arith.cmpi slt, %24, %27 : vector<34x1xi32>
    %c0_i32_21 = arith.constant 0 : i32
    %29 = arith.cmpi slt, %22, %c0_i32_21 : i32
    %30 = vector.broadcast %29 : i1 to vector<34x1xi1>
    %31 = vector.broadcast %30 : vector<34x1xi1> to vector<34x1xi1>
    %32 = arith.xori %28, %31 : vector<34x1xi1>
    %33 = arith.andi %32, %26 : vector<34x1xi1>
    %34 = vector.broadcast %22 : i32 to vector<34x1xi32>
    %35 = arith.addi %24, %34 : vector<34x1xi32>
    %36 = arith.select %33, %35, %24 : vector<34x1xi1>, vector<34x1xi32>
    %c16_i32 = arith.constant 16 : i32
    %37 = vector.broadcast %c16_i32 : i32 to vector<34x1xi32>
    %38 = arith.cmpi slt, %36, %37 : vector<34x1xi32>
    %cst_22 = arith.constant 0.000000e+00 : f32
    %39 = vector.shape_cast %38 : vector<34x1xi1> to vector<34x1xi1>
    %40 = vector.broadcast %39 : vector<34x1xi1> to vector<34x128xi1>
    %41 = vector.broadcast %cst_22 : f32 to vector<34x128xf32>
    %42 = arith.select %40, %19, %41 : vector<34x128xi1>, vector<34x128xf32>
    %43 = arith.truncf %42 : vector<34x128xf32> to vector<34x128xbf16>
    %c1_23 = arith.constant 1 : index
    %c0_24 = arith.constant 0 : index
    %44 = vector.load %arg8[%c1_23, %c0_24] : memref<36x128xbf16, #tpu.memory_space<vmem>>, vector<34x128xbf16>
    tpu.vector_store %arg8[%c1_23, %c0_24], %43 {strides = array<i32>} : memref<36x128xbf16, #tpu.memory_space<vmem>>, vector<34x128xbf16>,
    %c0_25 = arith.constant 0 : index
    %c0_26 = arith.constant 0 : index
    %45 = vector.load %arg8[%c0_25, %c0_26] : memref<36x128xbf16, #tpu.memory_space<vmem>>, vector<34x128xbf16>
    %c1_27 = arith.constant 1 : index
    %c0_28 = arith.constant 0 : index
    %46 = vector.load %arg8[%c1_27, %c0_28] : memref<36x128xbf16, #tpu.memory_space<vmem>>, vector<34x128xbf16>
    %c2_29 = arith.constant 2 : index
    %c0_30 = arith.constant 0 : index
    %47 = vector.load %arg8[%c2_29, %c0_30] : memref<36x128xbf16, #tpu.memory_space<vmem>>, vector<34x128xbf16>
    %48 = tpu.concatenate %45, %46, %47 in 1 : vector<34x128xbf16>, vector<34x128xbf16>, vector<34x128xbf16> -> vector<34x384xbf16>
    %c0_31 = arith.constant 0 : index
    %c0_32 = arith.constant 0 : index
    %49 = vector.load %arg4[%c0_31, %c0_32] : memref<384x128xbf16, #tpu.memory_space<vmem>>, vector<384x128xbf16>
    %cst_33 = arith.constant dense<0.000000e+00> : vector<34x128xf32>
    %50 = tpu.matmul %48, %49, %cst_33 {dimension_numbers = #tpu.dot_dimension_numbers<[1], [0], [0], [1], [0, 0, 1, 1], [], []>} : vector<34x384xbf16>, vector<384x128xbf16>, vector<34x128xf32> -> vector<34x128xf32>
    %c0_34 = arith.constant 0 : index
    %c0_35 = arith.constant 0 : index
    %51 = vector.load %arg5[%c0_34, %c0_35] : memref<1x128xf32, #tpu.memory_space<vmem>>, vector<1x128xf32>
    %52 = vector.broadcast %51 : vector<1x128xf32> to vector<34x128xf32>
    %53 = arith.addf %50, %52 : vector<34x128xf32>
    %cst_36 = arith.constant 0.000000e+00 : f32
    %54 = vector.broadcast %cst_36 : f32 to vector<34x128xf32>
    %55 = arith.maximumf %53, %54 : vector<34x128xf32>
    %56 = arith.truncf %55 : vector<34x128xf32> to vector<34x128xbf16>
    %57 = vector.extract_strided_slice %56 {offsets = [0, 0], sizes = [16, 128], strides = [1, 1]} : vector<34x128xbf16> to vector<16x128xbf16>
    %c0_37 = arith.constant 0 : index
    %c0_38 = arith.constant 0 : index
    %c0_39 = arith.constant 0 : index
    %58 = vector.load %arg6[%c0_37, %c0_38, %c0_39] : memref<2x16x128xbf16, #tpu.memory_space<vmem>>, vector<1x16x128xbf16>
    %59 = vector.shape_cast %58 : vector<1x16x128xbf16> to vector<16x128xbf16>
    %60 = vector.shape_cast %57 : vector<16x128xbf16> to vector<1x16x128xbf16>
    tpu.vector_store %arg6[%c0_37, %c0_38, %c0_39], %60 {strides = array<i32>} : memref<2x16x128xbf16, #tpu.memory_space<vmem>>, vector<1x16x128xbf16>,
    %61 = vector.extract_strided_slice %56 {offsets = [18, 0], sizes = [16, 128], strides = [1, 1]} : vector<34x128xbf16> to vector<16x128xbf16>
    %c1_40 = arith.constant 1 : index
    %c0_41 = arith.constant 0 : index
    %c0_42 = arith.constant 0 : index
    %62 = vector.load %arg6[%c1_40, %c0_41, %c0_42] : memref<2x16x128xbf16, #tpu.memory_space<vmem>>, vector<1x16x128xbf16>
    %63 = vector.shape_cast %62 : vector<1x16x128xbf16> to vector<16x128xbf16>
    %64 = vector.shape_cast %61 : vector<16x128xbf16> to vector<1x16x128xbf16>
    tpu.vector_store %arg6[%c1_40, %c0_41, %c0_42], %64 {strides = array<i32>} : memref<2x16x128xbf16, #tpu.memory_space<vmem>>, vector<1x16x128xbf16>,
    return
  }
  func.func @transform_0(%arg0: i32) -> (i32, i32, i32) {
    %c0_i32 = arith.constant 0 : i32
    %c0_i32_0 = arith.constant 0 : i32
    %c0_i32_1 = arith.constant 0 : i32
    return %arg0, %c0_i32, %c0_i32_0 : i32, i32, i32
  }
  func.func @transform_1(%arg0: i32) -> (i32, i32) {
    %c0_i32 = arith.constant 0 : i32
    %c0_i32_0 = arith.constant 0 : i32
    %c0_i32_1 = arith.constant 0 : i32
    return %c0_i32, %c0_i32_0 : i32, i32
  }
  func.func @transform_2(%arg0: i32) -> (i32, i32) {
    %c0_i32 = arith.constant 0 : i32
    %c0_i32_0 = arith.constant 0 : i32
    %c0_i32_1 = arith.constant 0 : i32
    return %c0_i32, %c0_i32_0 : i32, i32
  }
  func.func @transform_3(%arg0: i32) -> (i32, i32) {
    %c0_i32 = arith.constant 0 : i32
    %c0_i32_0 = arith.constant 0 : i32
    %c0_i32_1 = arith.constant 0 : i32
    return %c0_i32, %c0_i32_0 : i32, i32
  }
  func.func @transform_4(%arg0: i32) -> (i32, i32) {
    %c0_i32 = arith.constant 0 : i32
    %c0_i32_0 = arith.constant 0 : i32
    %c0_i32_1 = arith.constant 0 : i32
    return %c0_i32, %c0_i32_0 : i32, i32
  }
  func.func @transform_5(%arg0: i32) -> (i32, i32, i32) {
    %c0_i32 = arith.constant 0 : i32
    %c0_i32_0 = arith.constant 0 : i32
    %c0_i32_1 = arith.constant 0 : i32
    return %arg0, %c0_i32, %c0_i32_0 : i32, i32, i32
  }
}

</mosaic_0001>

<bundles_post_ra>
// kernel: double_conv_nchw.1
= control target key start
LH: loop header
LB: loop body
LE: loop exit
PB: predicated region body
PF: predicated region fallthrough
CT: control target
= control target key end

     0   :  { %vm25_vm0 = vcmask 519168   ;;  %vm39_vm1 = vsmask.f32 256  ;;  %vm40_vm2 = vsmask.f32 4368  ;;  %v1175_v0 = vmov 0   ;;  %s1501_s0 = inlined_call_operand.vmem [shape: bf16[2,16,64], index: 0, kind: input, shape index: {}]   ;;  %s1502_s1 = inlined_call_operand.vmem [shape: bf16[192,128], index: 1, kind: input, shape index: {}]   ;;  %s1503_s3 = inlined_call_operand.vmem [shape: bf16[384,128], index: 3, kind: input, shape index: {}]   ;;  %s1504_s2 = inlined_call_operand.vmem [shape: f32[1,128], index: 2, kind: input, shape index: {}]   ;;  %s1505_s4 = inlined_call_operand.vmem [shape: f32[1,128], index: 4, kind: input, shape index: {}]   ;;  %s1506_s5 = inlined_call_operand.vmem [shape: bf16[2,16,128], index: 5, kind: output, shape index: {}]  }
   0x1   :  { %26 = vst.msk [vmem:[#allocation2] sm:$0xf] %vm25_vm0, %v1175_v0  ;;  %27 = vst.msk [vmem:[#allocation2 + $0x4] sm:$0xf] %vm25_vm0, %v1175_v0  ;;  %v37_v1 = vld [vmem:[%s1501_s0] sm:$0xf]  ;;  %300 = vmatprep.subr.bf16.mxu0 %v1175_v0 }
   0x2   :  { %28 = vst.msk [vmem:[#allocation2 + $0x8] sm:$0xf] %vm25_vm0, %v1175_v0  ;;  %29 = vst.msk [vmem:[#allocation2 + $0xc] sm:$0xf] %vm25_vm0, %v1175_v0  ;;  %v38_v2 = vld [vmem:[%s1501_s0 + $0x4] sm:$0xf] }
   0x3   :  { %vm63_vm3 = vsmask.f32 7938  ;;  %32 = vst [vmem:[#allocation3] sm:$0xf] %v1175_v0  ;;  %33 = vst [vmem:[#allocation3 + $0x4] sm:$0xf] %v1175_v0 }
   0x4   :  { %34 = vst [vmem:[#allocation3 + $0x8] sm:$0xf] %v1175_v0  ;;  %35 = vst [vmem:[#allocation3 + $0xc] sm:$0xf] %v1175_v0  ;;  %v43_v3 = vshrl.u32 %v37_v1, 16  ;;  %v46_v4 = vshll.u32 %v37_v1, 16 }
   0x5   :  { %36 = vst [vmem:[#allocation3 + $0x10] sm:$0x3] %v1175_v0  ;;  %v51_v5 = vshrl.u32 %v38_v2, 16  ;;  %v54_v6 = vshll.u32 %v38_v2, 16  ;;  %v962_v7 = vld [vmem:[%s1501_s0 + $0x8] sm:$0xf]  ;;  %vm1237_vm6 = vmor %vm39_vm1, %vm40_vm2 }
   0x6   :  { %vm70_vm4 = vcmask 516096   ;;  %v963_v8 = vld [vmem:[%s1501_s0 + $0xc] sm:$0xf]  ;;  %vm78_vm5 = vsmask.f32 1280  ;;  %v82_v9 = vshrl.u32 %v962_v7, 16  ;;  %vm1243_vm8 = vmand %vm25_vm0, %vm63_vm3 }
   0x7   :  { %v45_v11 = vrot.slane %v43_v3, 7  ;;  %v53_v12 = vrot.slane %v51_v5, 7  ;;  %vm79_vm7 = vsmask.f32 5392  ;;  %v85_v13 = vshll.u32 %v962_v7, 16  ;;  %vm71_vm10 = vmand %vm70_vm4, %vm39_vm1  ;;  %v1133_v22 = vld [vmem:[%s1502_s1] sm:$0xff]  }
   0x8   :  { %v84_v15 = vrot.slane %v82_v9, 6  ;;  %v91_v16 = vshrl.u32 %v963_v8, 16  ;;  %v94_v17 = vshll.u32 %v963_v8, 16  ;;  %vm103_vm9 = vcmask 519169   ;;  %v1134_v26 = vld [vmem:[%s1502_s1 + $0x8] sm:$0xff]   ;;  %301 = vmatpush1.bf16.msra.mxu0 %v1133_v22  ;;  %vm80_vm13 = vmor %vm78_vm5, %vm79_vm7  ;;  %v1135_v38 = vld [vmem:[%s1502_s1 + $0x10] sm:$0xff]  }
   0x9   :  { %v48_v18 = vor.u32 %v46_v4, %v45_v11  ;;  %v49_v19 = vrot.slane %v45_v11, 4  ;;  %v56_v20 = vor.u32 %v54_v6, %v53_v12  ;;  %v58_v21 = vrot.slane %v53_v12, 4  ;;  %v65_v28 = vld [vmem:[#allocation2] sm:$0xf]  ;;  %v72_v29 = vld [vmem:[#allocation2 + $0x8] sm:$0x1]  ;;  %302 = vmatprep.subr.bf16.mxu0 %v1175_v0 }
   0xa   :  { %v87_v23 = vrot.slane %v85_v13, 7  ;;  %v93_v24 = vrot.slane %v91_v16, 6  ;;  %v96_v25 = vrot.slane %v94_v17, 7  ;;  %vm104_vm11 = vsmask.f32 7942  ;;  %v1136_v40 = vld [vmem:[%s1502_s1 + $0x18] sm:$0xff]  }
   0xb   :  { %v57_v27 = vsel %vm1237_vm6, %v49_v19, %v56_v20  ;;  %vm1258_vm12 = vmand %vm103_vm9, %vm104_vm11  ;;  %v66_v31 = vsel %vm1243_vm8, %v48_v18, %v65_v28  ;;  %v73_v32 = vsel %vm71_vm10, %v58_v21, %v72_v29  ;;  %v106_v35 = vld [vmem:[#allocation2 + $0x8] sm:$0xe]  ;;  %vm30_vm14 = vcmask 517120   ;;  %v1137_v49 = vld [vmem:[%s1502_s1 + $0x20] sm:$0xff]   ;;  %s1176_s12 = smov 64  }
   0xc   :  { %69 = vst.msk [vmem:[#allocation2 + $0x4] sm:$0xf] %vm25_vm0, %v57_v27  ;;  %v88_v33 = vor.u32 %v87_v23, %v84_v15  ;;  %v97_v34 = vor.u32 %v96_v25, %v93_v24  ;;  %67 = vst [vmem:[#allocation2] sm:$0xf] %v66_v31  ;;  %303 = vmatpush1.bf16.msra.mxu0 %v1134_v26  ;;  %v1138_v57 = vld [vmem:[%s1502_s1 + $0x28] sm:$0xff]   ;;  %vm171_vm1 = vcmask 1046528  }
   0xd   :  { %74 = vst [vmem:[#allocation2 + $0x8] sm:$0x1] %v73_v32  ;;  %31 = vst.msk [vmem:[#allocation2 + $0x10] sm:$0x3] %vm30_vm14, %v1175_v0  ;;  %304 = vmatprep.subr.bf16.mxu0 %v1175_v0  ;;  %vm177_vm2 = vcmask 523264   ;;  %v1139_v1 = vld [vmem:[%s1502_s1 + $0x30] sm:$0xff]  }
   0xe   :  { %v89_v36 = vrot.slane %v88_v33, 4  ;;  %v107_v37 = vsel %vm1258_vm12, %v88_v33, %v106_v35  ;;  %v99_v41 = vrot.slane %v97_v34, 4  ;;  %vm111_vm15 = vmand %vm30_vm14, %vm78_vm5  ;;  %v1140_v8 = vld [vmem:[%s1502_s1 + $0x38] sm:$0xff]   ;;  %v1141_v12 = vld [vmem:[%s1502_s1 + $0x40] sm:$0xff]  }
   0xf   :  { %108 = vst [vmem:[#allocation2 + $0x8] sm:$0xe] %v107_v37  ;;  %v1142_v13 = vld [vmem:[%s1502_s1 + $0x48] sm:$0xff]   ;;  %v1143_v14 = vld [vmem:[%s1502_s1 + $0x50] sm:$0xff]   ;;  %v1144_v15 = vld [vmem:[%s1502_s1 + $0x58] sm:$0xff]  }
  0x10   :  { %v98_v39 = vsel %vm80_vm13, %v89_v36, %v97_v34  ;;  %305 = vmatpush1.bf16.msra.mxu0 %v1135_v38  ;;  %v1147_v23 = vld [vmem:[%s1503_s3] sm:$0xff]   ;;  %v1148_v24 = vld [vmem:[%s1503_s3 + $0x48] sm:$0xff]   ;;  %v1150_v26 = vld [vmem:[%s1503_s3 + $0x50] sm:$0xff]   ;;  %v1177_v38 = vmov 0.0  }
  0x11   :  { %109 = vst.msk [vmem:[#allocation2 + $0xc] sm:$0xf] %vm25_vm0, %v98_v39  ;;  %306 = vmatprep.subr.bf16.mxu0 %v1175_v0  ;;  %vm138_vm0 = vsmask.f32 7424  ;;  %v1149_v25 = vld [vmem:[%s1503_s3 + $0x8] sm:$0xff]   ;;  %v1151_v27 = vld [vmem:[%s1503_s3 + $0x10] sm:$0xff]   ;;  %v361_v39 = vlaneseq }
  0x12   :  { %v1152_v28 = vld [vmem:[%s1503_s3 + $0x58] sm:$0xff]   ;;  %v1154_v30 = vld [vmem:[%s1503_s3 + $0x60] sm:$0xff]   ;;  %v1156_v32 = vld [vmem:[%s1503_s3 + $0x68] sm:$0xff]  }
  0x13   :  { %v116_v42 = vld [vmem:[#allocation2 + $0x4] sm:$0xf]  ;;  %v115_v43 = vld [vmem:[#allocation2] sm:$0xf]  ;;  %v1153_v29 = vld [vmem:[%s1503_s3 + $0x18] sm:$0xff]  }
  0x14   :  { %v964_v44 = vcombine.low %v115_v43, %v116_v42  ;;  %v112_v45 = vld [vmem:[#allocation2 + $0x10] sm:$0x3]  ;;  %307 = vmatpush1.bf16.msra.mxu0 %v1136_v40  ;;  %v121_v52 = vld [vmem:[#allocation2] sm:$0xe]  ;;  %v1157_v33 = vld [vmem:[%s1503_s3 + $0x28] sm:$0xff]   ;;  %v362_v40 = vshrl.u32 %v361_v39, 7 }
  0x15   :  { %v113_v46 = vsel %vm111_vm15, %v99_v41, %v112_v45  ;;  %308 = vmatprep.subr.bf16.mxu0 %v1175_v0  ;;  %v968_v54 = vcombine.low %v121_v52, %v116_v42  ;;  %v1155_v31 = vld [vmem:[%s1503_s3 + $0x20] sm:$0xff]   ;;  %v1158_v34 = vld [vmem:[%s1503_s3 + $0x70] sm:$0xff]   ;;  %v1160_v36 = vld [vmem:[%s1503_s3 + $0x78] sm:$0xff]  }
  0x16   :  { %v140_v47 = vshrl.u32 %v964_v44, 16  ;;  %v142_v48 = vshll.u32 %v964_v44, 16  ;;  %114 = vst [vmem:[#allocation2 + $0x10] sm:$0x3] %v113_v46  ;;  %v1159_v35 = vld [vmem:[%s1503_s3 + $0x30] sm:$0xff]   ;;  %v1161_v37 = vld [vmem:[%s1503_s3 + $0x38] sm:$0xff]  }
  0x17   :  { %v172_v60 = vrot.slane %v968_v54, 1  ;;  %v363_v41 = vadd.s32 8, %v362_v40  ;;  %v1372_v42 = vmul.u32.u64.low 3817748708, %v362_v40  ;;  %v1373_v43 = vmul.u32.u64.high 3817748708, %v362_v40, %v1372_v42  ;;  %v1165_v10 = vld [vmem:[%s1503_s3 + $0x88] sm:$0xff]  }
  0x18   :  { %v1131_v50 = vld [vmem:[#allocation2 + $0x8] sm:$0xff]   ;;  %v144_v51 = vrot.slane %v142_v48, 1  ;;  %309 = vmatpush1.bf16.msra.mxu0 %v1137_v49  ;;  %v364_v46 = vadd.s32 16, %v362_v40 }
  0x19   :  { %v147_v53 = vshll.u32 %v1131_v50, 16  ;;  %v173_v55 = vrot.slane %v1131_v50, 1  ;;  %v151_v59 = vshrl.u32 %v1131_v50, 16  ;;  %310 = vmatprep.subr.bf16.mxu0 %v1175_v0  ;;  %v373_v48 = vshrl.u32 %v1373_v43, 4 }
  0x1a   :  { %v145_v56 = vor.u32 %v144_v51, %v140_v47  ;;  %v365_v47 = vadd.s32 24, %v362_v40 }
  0x1b   :  { %v149_v58 = vrot.slane %v147_v53, 1  ;;  %v174_v63 = vsel %vm171_vm1, %v172_v60, %v173_v55  ;;  %v374_v54 = vmul.u32 18, %v373_v48 }
  0x1c   :  { %311 = vmatpush1.bf16.msra.mxu0 %v1138_v57  ;;  %982 = vmatprep.mubr.msk.bf16.mxu0 %vm177_vm2, %v174_v63  ;;  %v1383_v52 = vmul.u32.u64.low 3817748708, %v365_v47  ;;  %v1384_v53 = vmul.u32.u64.high 3817748708, %v365_v47, %v1383_v52 }
  0x1d   :  { %v150_v61 = vsel %vm138_vm0, %v145_v56, %v149_v58  ;;  %v1132_v62 = vld [vmem:[#allocation2 + $0x10] ss:$0 sps:$4 sm:$0x33]   ;;  %v153_v2 = vor.u32 %v151_v59, %v149_v58  ;;  %312 = vmatprep.subr.bf16.mxu0 %v1175_v0  ;;  %v375_v57 = vsub.s32 %v362_v40, %v374_v54 }
  0x1e   :  { %162 = vrot.lane.b32.xlu0 %v150_v61, %s1176_s12  ;;  %v155_v3 = vshll.u32 %v1132_v62, 16  ;;  %v159_v4 = vshrl.u32 %v1132_v62, 16  ;;  %v175_v5 = vrot.slane %v1132_v62, 1  ;;  %v1145_v20 = vld [vmem:[#allocation2 + $0x10] ss:$0 sps:$4 sm:$0x11]  }
  0x1f   :  { %v406_v62 = vshrl.u32 %v1384_v53, 4  ;;  %vm422_vm4 = vcmp.ne.s32.totalorder %v375_v57, 0  ;;  %vm427_vm7 = vcmp.lt.s32.totalorder %v375_v57, 0 }
  0x20   :  { %v157_v6 = vrot.slane %v155_v3, 1  ;;  %v176_v7 = vsel %vm171_vm1, %v173_v55, %v175_v5  ;;  %313 = vmatpush1.bf16.msra.mxu0 %v1139_v1  ;;  %v366_v55 = vadd.s32 32, %v362_v40  ;;  %v437_v1 = vadd.s32 18, %v375_v57  ;;  %vm432_vm10 = vmand %vm427_vm7, %vm422_vm4 }
  0x21   :  { %314 = vmatprep.subr.bf16.mxu0 %v1175_v0 }
  0x22   :  { %v158_v9 = vsel %vm138_vm0, %v153_v2, %v157_v6  ;;  %v161_v11 = vor.u32 %v159_v4, %v157_v6  ;;  %v1387_v59 = vmul.u32.u64.low 3817748708, %v366_v55  ;;  %v1388_v60 = vmul.u32.u64.high 3817748708, %v366_v55, %v1387_v59 }
  0x23   :  { %164 = vrot.lane.b32.xlu0 %v158_v9, %s1176_s12  ;;  %v407_v2 = vmul.u32 18, %v406_v62 }
  0x24   :  { %166 = vrot.lane.b32.xlu1 %v161_v11, %s1176_s12  ;;  %315 = vmatpush1.bf16.msra.mxu0 %v1140_v8  ;;  %v417_v6 = vshrl.u32 %v1388_v60, 4  ;;  %v442_v8 = vsel %vm432_vm10, %v437_v1, %v375_v57 }
  0x25   :  { %316 = vmatprep.subr.bf16.mxu0 %v1175_v0  ;;  %v408_v9 = vsub.s32 %v365_v47, %v407_v2  ;;  %vm447_vm14 = vcmp.lt.s32.totalorder %v442_v8, 16 }
  0x27   :  { %vm425_vm15 = vcmp.ne.s32.totalorder %v408_v9, 0 }
  0x28   :  { %317 = vmatpush1.bf16.msra.mxu0 %v1141_v12 }
  0x29   :  { %318 = vmatprep.subr.bf16.mxu0 %v1175_v0 }
  0x2c   :  { %319 = vmatpush1.bf16.msra.mxu0 %v1142_v13 }
  0x2d   :  { %320 = vmatprep.subr.bf16.mxu0 %v1175_v0 }
  0x30   :  { %321 = vmatpush1.bf16.msra.mxu0 %v1143_v14 }
  0x31   :  { %322 = vmatprep.subr.bf16.mxu0 %v1175_v0  ;;  %v1146_v0 = vld [vmem:[%s1503_s3 + $0x40] sm:$0xff]  }
  0x32   :  { %1043 = vmatprep.subr.bf16.mxu1 %v1146_v0 }
  0x33   :  { %1044 = vmatpush3.bf16.msra.mxu1 %v1147_v23  ;;  %v440_v23 = vadd.s32 18, %v408_v9 }
  0x34   :  { %323 = vmatpush1.bf16.msra.mxu0 %v1144_v15  ;;  %1045 = vmatprep.subr.bf16.mxu1 %v1148_v24  ;;  %v418_v15 = vmul.u32 18, %v417_v6 }
  0x36   :  { %v419_v24 = vsub.s32 %v366_v55, %v418_v15 }
  0x37   :  { %1046 = vmatpush3.bf16.msra.mxu1 %v1149_v25 }
  0x38   :  { %1047 = vmatprep.subr.bf16.mxu1 %v1150_v26  ;;  %vm426_vm10 = vcmp.ne.s32.totalorder %v419_v24, 0 }
  0x3b   :  { %1048 = vmatpush3.bf16.msra.mxu1 %v1151_v27 }
  0x3c   :  { %1049 = vmatprep.subr.bf16.mxu1 %v1152_v28 }
  0x3f   :  { %1050 = vmatpush3.bf16.msra.mxu1 %v1153_v29 }
  0x40   :  { %1051 = vmatprep.subr.bf16.mxu1 %v1154_v30 }
  0x43   :  { %1052 = vmatpush3.bf16.msra.mxu1 %v1155_v31 }
  0x44   :  { %1053 = vmatprep.subr.bf16.mxu1 %v1156_v32 }
  0x47   :  { %1054 = vmatpush3.bf16.msra.mxu1 %v1157_v33 }
  0x48   :  { %1055 = vmatprep.subr.bf16.mxu1 %v1158_v34 }
  0x4b   :  { %1056 = vmatpush3.bf16.msra.mxu1 %v1159_v35 }
  0x4c   :  { %1057 = vmatprep.subr.bf16.mxu1 %v1160_v36 }
  0x4f   :  { %1058 = vmatpush3.bf16.msra.mxu1 %v1161_v37 }
  0x50   :  { %1088 = vmatprep.subr.bf16.mxu1 %v1177_v38 }
  0x90   :  { %v163_v16 = vpop.permute.xlu0 %162 }
  0x91   :  { %v179_v17 = vsel %vm177_vm2, %v964_v44, %v163_v16  ;;  %v1375_v44 = vmul.u32.u64.low 3817748708, %v363_v41  ;;  %v1376_v45 = vmul.u32.u64.high 3817748708, %v363_v41, %v1375_v44 }
  0x92   :  { %333 = vmatmul.mubr.bf16.vlgmr.msra.gmra.mrb[0].mxu0 %v179_v17 }
  0x93   :  { %983 = vmatprep.mubr.msk.bf16.mxu0 %vm177_vm2, %v176_v7  ;;  %v384_v51 = vshrl.u32 %v1376_v45, 4  ;;  %v1399_v7 = vld [vmem:[%s1504_s2] ss:$0 sm:$0xff]  ;;  %v441_v45 = vadd.s32 18, %v419_v24 }
  0x95   :  { %v165_v18 = vpop.permute.xlu0 %164  ;;  %v385_v56 = vmul.u32 18, %v384_v51 }
  0x96   :  { %v182_v19 = vsel %vm177_vm2, %v1131_v50, %v165_v18  ;;  %v167_v21 = vpop.permute.xlu1 %166  ;;  %v1379_v49 = vmul.u32.u64.low 3817748708, %v364_v46  ;;  %v1380_v50 = vmul.u32.u64.high 3817748708, %v364_v46, %v1379_v49 }
  0x97   :  { %v186_v22 = vsel %vm177_vm2, %v1145_v20, %v167_v21  ;;  %v386_v61 = vsub.s32 %v363_v41, %v385_v56  ;;  %v533_v41 = vld [vmem:[#allocation3] sm:$0xf] }
  0x98   :  { %v395_v58 = vshrl.u32 %v1380_v50, 4 }
  0x99   :  { %vm423_vm8 = vcmp.ne.s32.totalorder %v386_v61, 0  ;;  %vm428_vm9 = vcmp.lt.s32.totalorder %v386_v61, 0  ;;  %v438_v3 = vadd.s32 18, %v386_v61 }
  0x9a   :  { %341 = vmatmul.mubr.bf16.gmra.mrb[4].mxu0 %v182_v19  ;;  %v396_v63 = vmul.u32 18, %v395_v58  ;;  %vm1391_vm11 = vmand %vm428_vm9, %vm423_vm8  ;;  %vm531_vm9 = vcmask 1043456  }
  0x9b   :  { %984 = vmatprep.mubr.msk.bf16.mxu0 %vm177_vm2, %v175_v5  ;;  %v443_v12 = vsel %vm1391_vm11, %v438_v3, %v386_v61  ;;  %vm430_vm2 = vcmp.lt.s32.totalorder %v408_v9, 0  ;;  %vm431_vm11 = vcmp.lt.s32.totalorder %v419_v24, 0 }
  0x9c   :  { %v397_v5 = vsub.s32 %v364_v46, %v396_v63  ;;  %vm448_vm4 = vcmp.lt.s32.totalorder %v443_v12, 16  ;;  %vm1409_vm8 = vmand %vm430_vm2, %vm425_vm15  ;;  %vm539_vm2 = vcmask 1041408  }
  0x9d   :  { %v445_v34 = vsel %vm1409_vm8, %v440_v23, %v408_v9  ;;  %vm1426_vm15 = vmand %vm431_vm11, %vm426_vm10 }
  0x9e   :  { %vm424_vm12 = vcmp.ne.s32.totalorder %v397_v5, 0  ;;  %vm429_vm13 = vcmp.lt.s32.totalorder %v397_v5, 0  ;;  %v439_v17 = vadd.s32 18, %v397_v5  ;;  %v446_v57 = vsel %vm1426_vm15, %v441_v45, %v419_v24 }
  0x9f   :  { %vm1405_vm7 = vmand %vm429_vm13, %vm424_vm12 }
  0xa0   :  { %v444_v28 = vsel %vm1405_vm7, %v439_v17, %v397_v5  ;;  %vm1419_vm13 = vmand %vm531_vm9, %vm63_vm3  ;;  %vm451_vm3 = vcmp.lt.s32.totalorder %v446_v57, 16 }
  0xa1   :  { %vm449_vm12 = vcmp.lt.s32.totalorder %v444_v28, 16 }
  0xa2   :  { %349 = vmatmul.mubr.bf16.gmra.mrb[8].mxu0 %v186_v22 }
 0x165   :  { %v334_v11 = vpop.f32.mrb[0].mxu0 }
 0x166   :  { %v335_v13 = vadd.f32 %v1399_v7, %v334_v11  ;;  %v336_v14 = vpop.f32.mrb[1].mxu0 }
 0x167   :  { %v337_v16 = vpop.f32.mrb[2].mxu0 }
 0x168   :  { %v356_v18 = vmax.f32 %v335_v13, 0.0  ;;  %v338_v19 = vadd.f32 %v1399_v7, %v337_v16  ;;  %v339_v20 = vpop.f32.mrb[3].mxu0 }
 0x16a   :  { %v462_v22 = vsel %vm447_vm14, %v356_v18, 0.0  ;;  %v357_v0 = vmax.f32 %v338_v19, 0.0  ;;  %vm450_vm14 = vcmp.lt.s32.totalorder %v445_v34, 16 }
 0x16b   :  { %v1028_v25 = vpack.c.bf16 %v462_v22, %v462_v22 }
 0x16c   :  { %v463_v27 = vsel %vm448_vm4, %v357_v0, 0.0  ;;  %vm540_vm4 = vmand %vm539_vm2, %vm78_vm5  ;;  %vm1178_vm5 = vmmov 0  }
 0x16d   :  { %v484_v29 = vshrl.u32 %v1028_v25, 16  ;;  %v1029_v30 = vpack.c.bf16 %v463_v27, %v463_v27  ;;  %v342_v31 = vpop.f32.mrb[4].mxu0  ;;  %v487_v36 = vshll.u32 %v1028_v25, 16  ;;  %v541_v25 = vld [vmem:[#allocation3 + $0x10] sm:$0x3] }
 0x16e   :  { %v343_v32 = vadd.f32 %v1399_v7, %v342_v31  ;;  %v344_v33 = vpop.f32.mrb[5].mxu0 }
 0x16f   :  { %v486_v35 = vrot.slane %v484_v29, 7  ;;  %v492_v37 = vshrl.u32 %v1029_v30, 16  ;;  %v345_v39 = vpop.f32.mrb[6].mxu0  ;;  %v495_v48 = vshll.u32 %v1029_v30, 16 }
 0x170   :  { %v358_v42 = vmax.f32 %v343_v32, 0.0  ;;  %v346_v43 = vadd.f32 %v1399_v7, %v345_v39  ;;  %v347_v44 = vpop.f32.mrb[7].mxu0 }
 0x171   :  { %v489_v46 = vor.u32 %v487_v36, %v486_v35  ;;  %v494_v47 = vrot.slane %v492_v37, 7  ;;  %v490_v52 = vrot.slane %v486_v35, 4  ;;  %v1164_v35 = vld [vmem:[%s1503_s3 + $0x80] sm:$0xff]   ;;  %v1167_v44 = vld [vmem:[%s1503_s3 + $0x90] sm:$0xff]  }
 0x172   :  { %v464_v50 = vsel %vm449_vm12, %v358_v42, 0.0  ;;  %v359_v51 = vmax.f32 %v346_v43, 0.0 }
 0x173   :  { %v534_v53 = vsel %vm1419_vm13, %v489_v46, %v533_v41  ;;  %v497_v54 = vor.u32 %v495_v48, %v494_v47  ;;  %v1030_v55 = vpack.c.bf16 %v464_v50, %v464_v50  ;;  %v499_v8 = vrot.slane %v494_v47, 4  ;;  %v1168_v47 = vld [vmem:[%s1503_s3 + $0x98] sm:$0xff]   ;;  %v1170_v48 = vld [vmem:[%s1503_s3 + $0xa0] sm:$0xff]   ;;  %v1171_v50 = vld [vmem:[%s1503_s3 + $0xa8] sm:$0xff]  }
 0x174   :  { %535 = vst [vmem:[#allocation3] sm:$0xf] %v534_v53  ;;  %v465_v56 = vsel %vm450_vm14, %v359_v51, 0.0  ;;  %v1172_v51 = vld [vmem:[%s1503_s3 + $0xb0] sm:$0xff]   ;;  %v1173_v53 = vld [vmem:[%s1503_s3 + $0xb8] sm:$0xff]  }
 0x175   :  { %v498_v58 = vsel %vm1237_vm6, %v490_v52, %v497_v54  ;;  %v501_v59 = vshrl.u32 %v1030_v55, 16  ;;  %v1031_v60 = vpack.c.bf16 %v465_v56, %v465_v56  ;;  %v350_v61 = vpop.f32.mrb[8].mxu0  ;;  %v504_v2 = vshll.u32 %v1030_v55, 16 }
 0x176   :  { %536 = vst [vmem:[#allocation3 + $0x4] sm:$0xf] %v498_v58  ;;  %v351_v62 = vadd.f32 %v1399_v7, %v350_v61  ;;  %v352_v63 = vpop.f32.mrb[9].mxu0 }
 0x177   :  { %v503_v1 = vrot.slane %v501_v59, 7  ;;  %v510_v3 = vshrl.u32 %v1031_v60, 16  ;;  %v353_v4 = vpop.f32.mrb[10].mxu0  ;;  %v513_v12 = vshll.u32 %v1031_v60, 16 }
 0x178   :  { %v360_v5 = vmax.f32 %v351_v62, 0.0  ;;  %v354_v6 = vpop.f32.mrb[11].mxu0 }
 0x179   :  { %v506_v9 = vor.u32 %v504_v2, %v503_v1  ;;  %v512_v11 = vrot.slane %v510_v3, 7  ;;  %v508_v15 = vrot.slane %v503_v1, 4 }
 0x17a   :  { %v466_v13 = vsel %vm451_vm3, %v360_v5, 0.0 }
 0x17b   :  { %v507_v14 = vsel %vm1237_vm6, %v499_v8, %v506_v9  ;;  %v515_v16 = vor.u32 %v513_v12, %v512_v11  ;;  %v1032_v17 = vpack.c.bf16 %v466_v13, %v466_v13  ;;  %v544_v20 = vld [vmem:[#allocation3] sm:$0xf]  ;;  %v517_v23 = vrot.slane %v512_v11, 4 }
 0x17c   :  { %537 = vst [vmem:[#allocation3 + $0x8] sm:$0xf] %v507_v14  ;;  %v550_v52 = vld [vmem:[#allocation3] sm:$0xe] }
 0x17d   :  { %v516_v7 = vsel %vm1237_vm6, %v508_v15, %v515_v16  ;;  %v519_v18 = vshrl.u32 %v1032_v17, 16  ;;  %v522_v19 = vshll.u32 %v1032_v17, 16  ;;  %v1441_v21 = vld [vmem:[#allocation3 + $0x4] sm:$0xf] }
 0x17e   :  { %538 = vst [vmem:[#allocation3 + $0xc] sm:$0xf] %v516_v7  ;;  %v990_v22 = vcombine.low %v544_v20, %v1441_v21  ;;  %v994_v54 = vcombine.low %v550_v52, %v1441_v21 }
 0x17f   :  { %v521_v0 = vrot.slane %v519_v18, 7 }
 0x180   :  { %v573_v26 = vshll.u32 %v990_v22, 16  ;;  %v571_v31 = vshrl.u32 %v990_v22, 16  ;;  %v599_v56 = vrot.slane %v994_v54, 1 }
 0x181   :  { %v524_v24 = vor.u32 %v522_v19, %v521_v0 }
 0x182   :  { %v575_v30 = vrot.slane %v573_v26, 1 }
 0x183   :  { %v525_v27 = vsel %vm1237_vm6, %v517_v23, %v524_v24  ;;  %vm943_vm6 = vcmask 1042432  }
 0x184   :  { %v542_v28 = vsel %vm540_vm4, %v525_v27, %v541_v25  ;;  %v576_v33 = vor.u32 %v575_v30, %v571_v31 }
 0x185   :  { %543 = vst [vmem:[#allocation3 + $0x10] sm:$0x3] %v542_v28  ;;  %v1163_v29 = vld [vmem:[#allocation3 + $0x8] sm:$0xff]  }
 0x186   :  { %v578_v32 = vshll.u32 %v1163_v29, 16  ;;  %v582_v39 = vshrl.u32 %v1163_v29, 16  ;;  %v600_v55 = vrot.slane %v1163_v29, 1 }
 0x188   :  { %v580_v34 = vrot.slane %v578_v32, 1  ;;  %v601_v57 = vsel %vm171_vm1, %v599_v56, %v600_v55 }
 0x18a   :  { %v581_v36 = vsel %vm138_vm0, %v576_v33, %v580_v34  ;;  %v584_v41 = vor.u32 %v582_v39, %v580_v34 }
 0x18b   :  { %838 = vmatprep.mubr.bf16.mxu1 %v581_v36 }
 0x18c   :  { %v1166_v37 = vld [vmem:[#allocation3 + $0x10] ss:$0 sps:$4 sm:$0x33]   ;;  %839 = vmatmul.mubr.bf16.vlgmr.msra.gmra.mrb[0].mxu1 %v990_v22 }
 0x18d   :  { %1089 = vmatpush3.bf16.msra.mxu1 %v1164_v35  ;;  %v586_v40 = vshll.u32 %v1166_v37, 16  ;;  %v590_v45 = vshrl.u32 %v1166_v37, 16  ;;  %v1169_v49 = vld [vmem:[#allocation3 + $0x10] ss:$0 sps:$4 sm:$0x11]   ;;  %v602_v58 = vrot.slane %v1166_v37, 1 }
 0x18e   :  { %1090 = vmatprep.subr.bf16.mxu1 %v1177_v38 }
 0x18f   :  { %v588_v42 = vrot.slane %v586_v40, 1  ;;  %v603_v59 = vsel %vm171_vm1, %v600_v55, %v602_v58 }
 0x191   :  { %1091 = vmatpush3.bf16.msra.mxu1 %v1165_v10  ;;  %v589_v43 = vsel %vm138_vm0, %v584_v41, %v588_v42  ;;  %v592_v46 = vor.u32 %v590_v45, %v588_v42  ;;  %vm944_vm0 = vcmask 1046532  }
 0x192   :  { %846 = vmatprep.mubr.bf16.mxu1 %v589_v43  ;;  %1092 = vmatprep.subr.bf16.mxu1 %v1177_v38  ;;  %vm945_vm1 = vmor %vm943_vm6, %vm944_vm0 }
 0x194   :  { %847 = vmatmul.mubr.bf16.gmra.mrb[4].mxu1 %v1163_v29 }
 0x195   :  { %1093 = vmatpush3.bf16.msra.mxu1 %v1167_v44  ;;  %854 = vmatprep.mubr.bf16.mxu1 %v592_v46 }
 0x196   :  { %1094 = vmatprep.subr.bf16.mxu1 %v1177_v38 }
 0x199   :  { %1095 = vmatpush3.bf16.msra.mxu1 %v1168_v47 }
 0x19a   :  { %1096 = vmatprep.subr.bf16.mxu1 %v1177_v38 }
 0x19c   :  { %855 = vmatmul.mubr.bf16.gmra.mrb[8].mxu1 %v1169_v49 }
 0x19d   :  { %1097 = vmatpush3.bf16.msra.mxu1 %v1170_v48  ;;  %1104 = vmatprep.mubr.msk.bf16.mxu1 %vm1178_vm5, %v1177_v38 }
 0x19e   :  { %1098 = vmatprep.subr.bf16.mxu1 %v1177_v38 }
 0x1a1   :  { %1099 = vmatpush3.bf16.msra.mxu1 %v1171_v50 }
 0x1a2   :  { %1100 = vmatprep.subr.bf16.mxu1 %v1177_v38 }
 0x1a5   :  { %1101 = vmatpush3.bf16.msra.mxu1 %v1172_v51 }
 0x1a6   :  { %1102 = vmatprep.subr.bf16.mxu1 %v1177_v38 }
 0x1a9   :  { %1103 = vmatpush3.bf16.msra.mxu1 %v1173_v53 }
 0x1ac   :  { %1105 = vmatmul.mubr.bf16.vlgmr.msra.gmra.mrb[12].mxu1 %v601_v57 }
 0x1ad   :  { %1108 = vmatprep.mubr.msk.bf16.mxu1 %vm1178_vm5, %v1177_v38 }
 0x1b4   :  { %1109 = vmatmul.mubr.bf16.gmra.mrb[16].mxu1 %v603_v59 }
 0x1b5   :  { %1112 = vmatprep.mubr.msk.bf16.mxu1 %vm1178_vm5, %v1177_v38  ;;  %v995_v38 = vld [vmem:[%s1505_s4] ss:$0 sm:$0xff] }
 0x1bc   :  { %1113 = vmatmul.mubr.bf16.gmra.mrb[20].mxu1 %v602_v58 }
 0x25f   :  { %v1059_v60 = vpop.f32.mrb[0].mxu1 }
 0x260   :  { %v1060_v61 = vpop.f32.mrb[1].mxu1 }
 0x261   :  { %v1061_v62 = vadd.f32 %v1060_v61, %v1059_v60  ;;  %v1062_v63 = vpop.f32.mrb[2].mxu1 }
 0x262   :  { %v1063_v1 = vpop.f32.mrb[3].mxu1 }
 0x263   :  { %v1064_v2 = vadd.f32 %v1063_v1, %v1062_v63  ;;  %v841_v16 = vadd.f32 %v1061_v62, %v995_v38 }
 0x265   :  { %v844_v19 = vadd.f32 %v1064_v2, %v995_v38 }
 0x267   :  { %v1065_v3 = vpop.f32.mrb[4].mxu1 }
 0x268   :  { %v1066_v4 = vpop.f32.mrb[5].mxu1 }
 0x269   :  { %v1067_v5 = vadd.f32 %v1066_v4, %v1065_v3  ;;  %v1068_v6 = vpop.f32.mrb[6].mxu1 }
 0x26a   :  { %v1069_v8 = vpop.f32.mrb[7].mxu1 }
 0x26b   :  { %v1070_v9 = vadd.f32 %v1069_v8, %v1068_v6  ;;  %v849_v25 = vadd.f32 %v1067_v5, %v995_v38 }
 0x26d   :  { %v852_v29 = vadd.f32 %v1070_v9, %v995_v38 }
 0x26f   :  { %v1071_v11 = vpop.f32.mrb[8].mxu1 }
 0x270   :  { %v1072_v12 = vpop.f32.mrb[9].mxu1 }
 0x271   :  { %v1073_v13 = vadd.f32 %v1072_v12, %v1071_v11  ;;  %v1074_v14 = vpop.f32.mrb[10].mxu1 }
 0x272   :  { %v1075_v15 = vpop.f32.mrb[11].mxu1 }
 0x273   :  { %v857_v37 = vadd.f32 %v1073_v13, %v995_v38 }
 0x27f   :  { %v896_v17 = vpop.f32.mrb[12].mxu1 }
 0x280   :  { %v897_v7 = vadd.f32 %v896_v17, %v841_v16  ;;  %v1106_v18 = vpop.f32.mrb[13].mxu1 }
 0x281   :  { %v899_v20 = vpop.f32.mrb[14].mxu1 }
 0x282   :  { %v900_v21 = vadd.f32 %v899_v20, %v844_v19  ;;  %v1107_v22 = vpop.f32.mrb[15].mxu1  ;;  %v918_v0 = vmax.f32 %v897_v7, 0.0 }
 0x284   :  { %v919_v23 = vmax.f32 %v900_v21, 0.0 }
 0x286   :  { %v1041_v24 = vpack.c.bf16 %v919_v23, %v918_v0 }
 0x287   :  { %v904_v26 = vpop.f32.mrb[16].mxu1 }
 0x288   :  { %1042 = vst [vmem:[%s1506_s5] sm:$0xff] %v1041_v24   ;;  %v905_v27 = vadd.f32 %v904_v26, %v849_v25  ;;  %v1110_v28 = vpop.f32.mrb[17].mxu1 }
 0x289   :  { %v907_v30 = vpop.f32.mrb[18].mxu1 }
 0x28a   :  { %v920_v31 = vmax.f32 %v905_v27, 0.0  ;;  %v908_v32 = vadd.f32 %v907_v30, %v852_v29  ;;  %v1111_v33 = vpop.f32.mrb[19].mxu1 }
 0x28c   :  { %v1035_v34 = vpack.c.bf16 %v920_v31, %v920_v31  ;;  %v921_v35 = vmax.f32 %v908_v32, 0.0 }
 0x28e   :  { %v1036_v36 = vpack.c.bf16 %v921_v35, %v921_v35  ;;  %v1025_v39 = vrot.slane %v1035_v34, 9 }
 0x28f   :  { %v912_v10 = vpop.f32.mrb[20].mxu1 }
 0x290   :  { %v948_v40 = vrot.slane %v1036_v36, 5  ;;  %v913_v41 = vadd.f32 %v912_v10, %v857_v37  ;;  %v1114_v42 = vpop.f32.mrb[21].mxu1 }
 0x291   :  { %v915_v43 = vpop.f32.mrb[22].mxu1 }
 0x292   :  { %v949_v44 = vsel %vm945_vm1, %v1025_v39, %v948_v40  ;;  %v922_v45 = vmax.f32 %v913_v41, 0.0  ;;  %v1115_v46 = vpop.f32.mrb[23].mxu1  ;;  %v950_v48 = vrot.slane %v948_v40, 4 }
 0x293   :  { %1026 = vst [vmem:[%s1506_s5 + $0x8] sm:$0xf] %v949_v44 }
 0x294   :  { %v1037_v47 = vpack.c.bf16 %v922_v45, %v922_v45 }
 0x296   :  { %v951_v49 = vrot.slane %v1037_v47, 5 }
 0x298   :  { %v952_v50 = vsel %vm945_vm1, %v950_v48, %v951_v49 }
 0x299   :  { %1027 = vst [vmem:[%s1506_s5 + $0xc] sm:$0xf] %v952_v50 }

</bundles_post_ra>
